<compile_context>
chip_gen: v7x
topology: tpu7x:2x2x1
jax: 0.10.0
libtpu: 0.0.40
codegen_flags: <defaults>
</compile_context>

<pallas_src>
import jax
import jax.numpy as jnp
from jax.experimental import pallas as pl
from jax.experimental.pallas import tpu as pltpu


# ---------------------------------------------------------------------------
# Tiling helpers
# ---------------------------------------------------------------------------
_VMEM_PIXEL_BUDGET = 256 * 1024      # tile_h * W cap  (~15 MiB of live blocks)
_VMEM_LIMIT_BYTES = 32 * 1024 * 1024


def _pick_tile_h(H, W):
    """Largest multiple-of-8 row tile dividing H within the VMEM budget."""
    cap = min(256, max(8, _VMEM_PIXEL_BUDGET // max(W, 1)))
    if H >= 16:
        cap = min(cap, max(8, H // 2))     # keep >=2 tiles when possible
    best = None
    th = 8
    while th <= min(H, cap):
        if H % th == 0:
            best = th
        th += 8
    # Fallback: whole-height block (allowed, equals the full array dim).
    return best if best is not None else H


def _pick_chunk(W):
    """Largest divisor of W that is <= 128 (bounds the spread-matrix size)."""
    for c in range(min(128, W), 0, -1):
        if W % c == 0:
            return c
    return W


# ---------------------------------------------------------------------------
# Kernel 1: per-row channel partial sums (light first pass for the global
# average pool).  Final combine over H happens on tiny (B, 3, H) data in XLA.
# ---------------------------------------------------------------------------
def _row_sums_kernel(x_ref, out_ref):
    out_ref[...] = jnp.sum(x_ref[...], axis=3, keepdims=True)


def _channel_row_sums(rgb, tile_h):
    B, _, H, W = rgb.shape
    grid = (B, H // tile_h)
    return pl.pallas_call(
        _row_sums_kernel,
        out_shape=jax.ShapeDtypeStruct((B, 3, H, 1), jnp.float32),
        grid=grid,
        in_specs=[pl.BlockSpec((1, 3, tile_h, W), lambda b, t: (b, 0, t, 0))],
        out_specs=pl.BlockSpec((1, 3, tile_h, 1), lambda b, t: (b, 0, t, 0)),
        compiler_params=pltpu.CompilerParams(
            dimension_semantics=("parallel", "parallel"),
            vmem_limit_bytes=_VMEM_LIMIT_BYTES),
    )(rgb)


# ---------------------------------------------------------------------------
# Kernel 2: main inverse-ISP pass (optionally fused with the Bayer mosaic).
# ---------------------------------------------------------------------------
def _make_isp_kernel(mosaic, n_chunks, chunk, W, tile_h):
    def kernel(*refs):
        if mosaic:
            coef_ref, x_ref, spread_ref, out_ref = refs
        else:
            coef_ref, x_ref, out_ref = refs

        b = pl.program_id(0)
        x = x_ref[0]                       # (3, tile_h, W) planar, lane-dense
        r, g, bl = x[0], x[1], x[2]

        def c(k):                          # per-batch scalar from SMEM
            return coef_ref[b, k]

        # 3x3 CCM with gain * tint folded in: 9 VPU FMAs + bias (no MXU).
        yr = c(0) * r + c(1) * g + c(2) * bl + c(9)
        yg = c(3) * r + c(4) * g + c(5) * bl + c(10)
        yb = c(6) * r + c(7) * g + c(8) * bl + c(11)

        def clamp_degamma(y):
            # torch.clamp(raw, 0, 1) followed by inverse gamma  y ** 2.2.
            # NOTE: 2 EUP transcendentals/pixel/channel; EUP has its own
            # bundle slot so this hides under the HBM-bound stores.
            y = jnp.clip(y, 0.0, 1.0)
            safe = jnp.where(y > 0.0, y, 1.0)
            return jnp.where(y > 0.0, jnp.exp(2.2 * jnp.log(safe)), 0.0)

        yr = clamp_degamma(yr)
        yg = clamp_degamma(yg)
        yb = clamp_degamma(yb)

        if not mosaic:
            # Planar NCHW output: dense, unmasked (tile_h, W) stores.
            out_ref[0, 0] = yr.astype(out_ref.dtype)
            out_ref[0, 1] = yg.astype(out_ref.dtype)
            out_ref[0, 2] = yb.astype(out_ref.dtype)
        else:
            # Fused Bayer mosaic.  For each input row h emit one 4W-wide
            # lane-dense row: [R G R G ... (even bayer row) | G B G B ... (odd)].
            # Lane interleave done with ONE one-hot spread matmul per lane
            # chunk: stack the even/odd source pairs on the sublane axis and
            # contract against a (2c, 2c) constant on the MXU.
            spread = spread_ref[...]       # (2*chunk, 2*chunk)
            for k in range(n_chunks):
                lo, hi = k * chunk, (k + 1) * chunk
                olo, ohi = 2 * lo, 2 * hi
                lhs_even = jnp.concatenate([yr[:, lo:hi], yg[:, lo:hi]], axis=1)
                lhs_odd = jnp.concatenate([yg[:, lo:hi], yb[:, lo:hi]], axis=1)
                lhs = jnp.concatenate([lhs_even, lhs_odd], axis=0)  # (2th, 2c)
                res = jnp.dot(lhs, spread,
                              preferred_element_type=jnp.float32)    # (2th, 2c)
                out_ref[0, :, olo:ohi] = res[:tile_h].astype(out_ref.dtype)
                out_ref[0, :, 2 * W + olo:2 * W + ohi] = (
                    res[tile_h:].astype(out_ref.dtype))

    return kernel


def _spread_matrix(chunk):
    """(2c, 2c) one-hot: row j -> lane 2j, row c+j -> lane 2j+1."""
    eye = jnp.eye(chunk, dtype=jnp.float32)
    z = jnp.zeros((chunk, 2 * chunk), jnp.float32)
    s_even = z.at[:, 0::2].set(eye)
    s_odd = z.at[:, 1::2].set(eye)
    return jnp.concatenate([s_even, s_odd], axis=0)


def _run_isp(rgb, coef, mosaic, tile_h, out_dtype=jnp.float32):
    B, _, H, W = rgb.shape
    grid = (B, H // tile_h)
    x_spec = pl.BlockSpec((1, 3, tile_h, W), lambda b, t: (b, 0, t, 0))
    coef_spec = pl.BlockSpec(memory_space=pltpu.MemorySpace.SMEM)
    cparams = pltpu.CompilerParams(
        dimension_semantics=("parallel", "parallel"),
        vmem_limit_bytes=_VMEM_LIMIT_BYTES)

    if not mosaic:
        kernel = _make_isp_kernel(False, 1, W, W, tile_h)
        return pl.pallas_call(
            kernel,
            out_shape=jax.ShapeDtypeStruct((B, 3, H, W), out_dtype),
            grid=grid,
            in_specs=[coef_spec, x_spec],
            out_specs=pl.BlockSpec((1, 3, tile_h, W), lambda b, t: (b, 0, t, 0)),
            compiler_params=cparams,
        )(coef, rgb)

    chunk = _pick_chunk(W)
    n_chunks = W // chunk
    spread = _spread_matrix(chunk)
    kernel = _make_isp_kernel(True, n_chunks, chunk, W, tile_h)
    out = pl.pallas_call(
        kernel,
        out_shape=jax.ShapeDtypeStruct((B, H, 4 * W), out_dtype),
        grid=grid,
        in_specs=[coef_spec, x_spec,
                  pl.BlockSpec((2 * chunk, 2 * chunk), lambda b, t: (0, 0))],
        out_specs=pl.BlockSpec((1, tile_h, 4 * W), lambda b, t: (b, t, 0)),
        compiler_params=cparams,
    )(coef, rgb, spread)
    # (B, H, 4W) -> (B, 2H, 2W): purely contiguous reshape (no data movement).
    return out.reshape(B, 2 * H, 2 * W)


# ---------------------------------------------------------------------------
# Condition heads (tiny per-batch scalar math) -> packed per-batch SMEM coefs.
# ---------------------------------------------------------------------------
def _condition_coefficients(sums, hw, params, eps):
    B = sums.shape[0]
    mean_c = sums / float(hw)                                   # (B, 3)
    mv_color = mean_c @ params["wc"] + params["bc"]             # (B, 2)
    mv_bright = mean_c @ params["wb"] + params["bb"]            # (B, 2)
    # Normal(mean, clamp_min(|var|, 1e-6)).sample()  (reparameterized w/ eps)
    std_c = jnp.maximum(jnp.abs(mv_color[:, 1]), 1e-6)
    std_b = jnp.maximum(jnp.abs(mv_bright[:, 1]), 1e-6)
    color_cond = mv_color[:, 0] + eps[:, 0] * std_c
    bright_cond = mv_bright[:, 0] + eps[:, 1] * std_b
    gain = jnp.exp(0.1 * bright_cond)                           # (B,)
    tint = 1.0 + 0.05 * jnp.tanh(color_cond)[:, None] * params["cdir"]  # (B, 3)
    scale = gain[:, None] * tint                                # per-cin scale
    a = scale[:, :, None] * params["ccm"][None, :, :]           # (B, cin, cout)
    m = jnp.transpose(a, (0, 2, 1)).reshape(B, 9)               # [cout, cin]
    bias = jnp.broadcast_to(params["bias"], (B, 3))
    return jnp.concatenate([m, bias], axis=1).astype(jnp.float32)  # (B, 12)


# ---------------------------------------------------------------------------
# Full forward:  DemoModel.forward(rgb, mosaic=...)
# ---------------------------------------------------------------------------
def demo_forward(rgb, params, eps, mosaic=False, out_dtype=jnp.float32):
    B, C, H, W = rgb.shape
    assert C == 3
    rgb = rgb.astype(jnp.float32)
    tile_h = _pick_tile_h(H, W)
    row_sums = _channel_row_sums(rgb, tile_h)            # (B, 3, H, 1)
    sums = jnp.sum(row_sums[..., 0], axis=2)             # (B, 3) final combine
    coef = _condition_coefficients(sums, H * W, params, eps)
    return _run_isp(rgb, coef, mosaic, tile_h, out_dtype)


# ---------------------------------------------------------------------------
# Deterministic synthetic parameters (checkpoint replacement)
# ---------------------------------------------------------------------------
def make_params():
    key = jax.random.PRNGKey(42)
    k1, k2 = jax.random.split(key)
    wc = jax.random.normal(k1, (3, 2), jnp.float32) * 0.1
    bc = jnp.array([[0.50, 0.05]], jnp.float32)
    wb = jax.random.normal(k2, (3, 2), jnp.float32) * 0.1
    bb = jnp.array([[0.40, 0.05]], jnp.float32)
    ccm = jnp.array([[0.70, 0.20, 0.10],
                     [0.15, 0.70, 0.15],
                     [0.10, 0.25, 0.65]], jnp.float32)
    bias = jnp.zeros((1, 3), jnp.float32)
    cdir = jnp.array([[1.0, 0.0, -1.0]], jnp.float32)
    return dict(wc=wc, bc=bc, wb=wb, bb=bb, ccm=ccm, bias=bias, cdir=cdir)


if __name__ == "__main__":
    key = jax.random.PRNGKey(0)
    k_img, k_eps = jax.random.split(key)

    B, C, H, W = 2, 3, 16, 16
    rgb = jax.random.uniform(k_img, (B, C, H, W), jnp.float32)   # NCHW, [0,1]
    # standard-normal noise for the reparameterized Normal(...).sample() calls
    eps = jax.random.normal(k_eps, (B, 2), jnp.float32)

    params = make_params()

    raw = demo_forward(rgb, params, eps, mosaic=False)   # forward(rgb)
    bayer = demo_forward(rgb, params, eps, mosaic=True)  # forward(rgb, mosaic=True)

    jax.block_until_ready((raw, bayer))
    assert raw.shape == (B, 3, H, W)
    assert bayer.shape == (B, 2 * H, 2 * W)
    assert float(jnp.min(raw)) >= 0.0 and float(jnp.max(raw)) <= 1.0
    assert float(jnp.min(bayer)) >= 0.0 and float(jnp.max(bayer)) <= 1.0

    # Cross-check the mosaic pattern against the raw output (same condition
    # sample): even rows = [R G ...], odd rows = [G B ...].
    chk = demo_forward(rgb, params, eps, mosaic=False)
    assert jnp.allclose(bayer[:, 0::2, 0::2], chk[:, 0], atol=1e-5)
    assert jnp.allclose(bayer[:, 0::2, 1::2], chk[:, 1], atol=1e-5)
    assert jnp.allclose(bayer[:, 1::2, 0::2], chk[:, 1], atol=1e-5)
    assert jnp.allclose(bayer[:, 1::2, 1::2], chk[:, 2], atol=1e-5)
    print("KERNEL_OK")
</pallas_src>

<mosaic_0001>
module attributes {stable_mosaic.version = 11 : i64} {
  func.func @_row_sums_kernel(%arg0: i32, %arg1: i32, %arg2: memref<1x3x8x16xf32, #tpu.memory_space<vmem>>, %arg3: memref<1x3x8x1xf32, #tpu.memory_space<vmem>>) attributes {dimension_semantics = [#tpu.dimension_semantics<parallel>, #tpu.dimension_semantics<parallel>], iteration_bounds = array<i64: 2, 2>, scalar_prefetch = 0 : i64, scratch_operands = 0 : i64, tpu.core_type = #tpu.core_type<tc>, window_params = [{transform_indices = @transform_0, window_bounds = array<i64: 1, 3, 8, 16>}, {transform_indices = @transform_1, window_bounds = array<i64: 1, 3, 8, 1>}]} {
    %c0 = arith.constant 0 : index
    %c0_0 = arith.constant 0 : index
    %c0_1 = arith.constant 0 : index
    %c0_2 = arith.constant 0 : index
    %0 = vector.load %arg2[%c0, %c0_0, %c0_1, %c0_2] : memref<1x3x8x16xf32, #tpu.memory_space<vmem>>, vector<1x3x8x16xf32>
    %cst = arith.constant dense<0.000000e+00> : vector<1x3x8xf32>
    %1 = vector.multi_reduction <add>, %0, %cst [3] : vector<1x3x8x16xf32> to vector<1x3x8xf32>
    %2 = vector.shape_cast %1 : vector<1x3x8xf32> to vector<1x3x8x1xf32>
    %c0_3 = arith.constant 0 : index
    %c0_4 = arith.constant 0 : index
    %c0_5 = arith.constant 0 : index
    %c0_6 = arith.constant 0 : index
    %3 = vector.load %arg3[%c0_3, %c0_4, %c0_5, %c0_6] : memref<1x3x8x1xf32, #tpu.memory_space<vmem>>, vector<1x3x8x1xf32>
    tpu.vector_store %arg3[%c0_3, %c0_4, %c0_5, %c0_6], %2 {strides = array<i32>} : memref<1x3x8x1xf32, #tpu.memory_space<vmem>>, vector<1x3x8x1xf32>,
    return
  }
  func.func @transform_0(%arg0: i32, %arg1: i32) -> (i32, i32, i32, i32) {
    %c0_i32 = arith.constant 0 : i32
    %c0_i32_0 = arith.constant 0 : i32
    %c0_i32_1 = arith.constant 0 : i32
    return %arg0, %c0_i32, %arg1, %c0_i32_0 : i32, i32, i32, i32
  }
  func.func @transform_1(%arg0: i32, %arg1: i32) -> (i32, i32, i32, i32) {
    %c0_i32 = arith.constant 0 : i32
    %c0_i32_0 = arith.constant 0 : i32
    %c0_i32_1 = arith.constant 0 : i32
    return %arg0, %c0_i32, %arg1, %c0_i32_0 : i32, i32, i32, i32
  }
}

</mosaic_0001>

<bundles_post_ra>
// kernel: tpu_custom_call.1
= control target key start
LH: loop header
LB: loop body
LE: loop exit
PB: predicated region body
PF: predicated region fallthrough
CT: control target
= control target key end

     0   :  { %6 = vsyncpa [#allocation3], 0  ;;  %s653_s0 = inlined_call_operand.hbm [shape: f32[2,3,16,16], index: 0, kind: input, shape index: {}]   ;;  %s654_s1 = inlined_call_operand.vmem [shape: f32[2,3,16,1], index: 1, kind: output, shape index: {}]  }
   0x1   :  { %8 = vsyncpa [#allocation3 + $0x1], 0  ;;  %s492_s6 = smov 0   ;;  %s494_s7 = smov 0  }
   0x2   :  { %s496_s8 = smov 0   ;;  %s498_s9 = smov 0  }
   0x3   :  { %s500_s10 = smov 0   ;;  %s502_s11 = smov 0  }
   0x4   :  { %s504_s12 = smov 0   ;;  %s506_s13 = smov 0  }
   0x5 LB: > { %s293_s14 = sadd.s32 4294967295, %s476_s13   ;;  %s23_s15 = sadd.s32 1, %s468_s11  ;;  %s476_s13 = sphi %s506_s13, %s14_s13   ;;  %s472_s12 = sphi %s504_s12, %s667_s12   ;;  %s468_s11 = sphi %s502_s11, %s666_s11   ;;  %s464_s10 = sphi %s500_s10, %s665_s10   ;;  %s460_s9 = sphi %s498_s9, %s664_s9   ;;  %s456_s8 = sphi %s496_s8, %s663_s8   ;;  %s452_s7 = sphi %s494_s7, %s662_s7   ;;  %s448_s6 = sphi %s492_s6, %s661_s6  }
   0x6   : > { %p24_p0 = scmp.ge.s32.totalorder %s23_s15, 2  ;;  %s26_s16 = sadd.s32 1, %s472_s12 }
   0x7   : > { %s35_s17 = sadd.s32 1, %s456_s8  ;;  %p42_p1 = scmp.ne.s32.totalorder %s456_s8, %s452_s7 }
   0x8   : > { %s669_s15 = smov (%p24_p0, %s23_s15), 0  ;;  %s671_s16 = smov (!%p24_p0, %s26_s16), %s472_s12 }
   0x9   : > { %s31_s18 = ssub.s32 %s468_s11, %s669_s15  ;;  %p43_p2 = scmp.eq.s32.totalorder %s476_s13, 0 }
   0xa   : > { %p28_p3 = scmp.ge.s32.totalorder %s671_s16, 2  ;;  %p48_p4 = scmp.ne.s32.totalorder %s452_s7, %s448_s6 }
   0xb   : > { %p546_p5 = por %p43_p2, %p42_p1  ;;  %p49_p6 = scmp.eq.s32.totalorder %s293_s14, 0 }
   0xc   : > { %s673_s16 = smov (%p28_p3, %s671_s16), 0  ;;  %p74_p8 = scmp.eq.s32.totalorder %s293_s14, 3 }
   0xd   : > { %p552_p7 = por %p49_p6, %p48_p4  ;;  %s30_s21 = ssub.s32 %s472_s12, %s673_s16 }
   0xe   : > { %s32_s22 = sor.u32 %s31_s18, %s30_s21  ;;  %p561_p9 = por %p74_p8, %p42_p1 }
   0xf   : > { %p33_p10 = scmp.eq.s32.totalorder %s32_s22, 0  ;;  %p312_p11 = scmp.lt.s32.totalorder %s476_s13, 4 }
  0x10   : > { %s657_s23 = scalar_select %p561_p9, 1, 0 }
  0x11   : > { %s100_s24 = sand.u32 1, %s456_s8   ;;  %s303_s25 = smul.u32 6, %s472_s12 }
  0x12   : > { %s569_s26 = scalar_select %p33_p10, %s456_s8, %s35_s17  }
  0x13   : > { %s302_s27 = smul.u32 24, %s100_s24  ;;  %s109_s28 = sadd.s32 %s468_s11, %s303_s25 }
  0x14   : > { %p574_p12 = pnand %p312_p11, %p546_p5  ;;  %s297_s30 = sshll.u32 %s109_s28, 7 }
  0x15   : > { %s581_s4 = scalar_lea.hbm %s653_s0, %s297_s30  ;;  %s104_s5 = scalar_lea.vmem [#allocation2], %s302_s27 }
  0x16   : > { %s112_s6 = sshll.u32 %s104_s5, 4  ;;  %s586_s14 = scalar_lea.sflag [#allocation3], %s100_s24  ;;  %s583_s6 = int_to_ptr.vmem [resolvable:$true] %s112_s6 }
  0x17   : > { %s380_s17 = scalar_lea.hbm %s581_s4, 384  ;;  %p382_p1 = pneg %p574_p12 }
  0x18   : > { %p381_p0 = scmp.ne.s32.totalorder %s581_s4, %s380_s17  ;;  %s385_s21 = scalar_lea.hbm %s653_s0, 1536 }
  0x19   : > { %p386_p4 = scmp.lt.u32.totalorder %s581_s4, %s653_s0  ;;  %p387_p5 = scmp.lt.u32.totalorder %s385_s21, %s380_s17 }
  0x1a   : > { %p383_p2 = pnand %p382_p1, %p381_p0  ;;  %p389_p8 = scmp.lt.u32.totalorder %s380_s17, %s581_s4 }
  0x1b   : > { %p388_p6 = por %p387_p5, %p386_p4 }
  0x1c   : > { %p384_p3 = pneg %p383_p2 }
  0x1d   : > { %p390_p10 = por %p389_p8, %p388_p6 }
  0x1f   : > { %p391_p11 = pnand %p390_p10, %p384_p3 }
  0x21   : > { %394 = shalt.err (!%p391_p11)
}
  0x22   : > { %s395_s24 = scalar_lea.vmem %s583_s6, 384  ;;  %s478_s27 = smov [#allocation2]  }
  0x23   : > { %p396_p0 = scmp.ne.s32.totalorder %s583_s6, %s395_s24  ;;  %s400_s28 = sshll.u32 %s478_s27, 4  ;;  %s401_s28 = int_to_ptr.vmem [resolvable:$false] %s400_s28 }
  0x24   : > { %s402_s30 = scalar_lea.vmem %s401_s28, 768  ;;  %p403_p9 = scmp.lt.s32.totalorder %s583_s6, %s401_s28 }
  0x25   : > { %p398_p2 = pnand %p396_p0, %p382_p1  ;;  %p404_p4 = scmp.lt.s32.totalorder %s402_s30, %s395_s24 }
  0x27   : > { %p399_p13 = pneg %p398_p2  ;;  %p405_p5 = por %p404_p4, %p403_p9 }
  0x29   : > { %p406_p6 = pnand %p405_p5, %p399_p13 }
  0x2b   : > { %409 = shalt.err (!%p406_p6)
}
  0x2c   : > { %s479_s2 = smov 256   ;;  %s480_s3 = smov 128  }
  0x2d   : > { %s481_s5 = smov 8   ;;  %p120_p1 = scmp.lt.s32.totalorder %s476_s13, 5 }
  0x2e   : > { %311 = dma.hbm_to_vmem [thread:$0]  (!%p574_p12), %s581_s4, 384, %s583_s6, %s586_s14, %s479_s2, %s480_s3, %s481_s5  }
  0x2f   : > { %p659_p3 = scmp.ge.s32.totalorder %s476_s13, 1 }
  0x31   : > { %p121_p8 = pnand %p659_p3, %p120_p1 }
  0x32   : > { %s126_s17 = sand.u32 (!%p121_p8), 1, %s452_s7  }
  0x33   : > { %124 = sbr.rel (%p121_p8) target bundleno = 216 (0xd8), region = 24  ;;  %s127_s19 = scalar_lea.sflag (!%p121_p8), [#allocation3], %s126_s17 }
  0x34   : > { %s304_s18 = smul.u32 (!%p121_p8), 24, %s126_s17 }
  0x36   : > { %s130_s21 = scalar_lea.vmem (!%p121_p8), [#allocation2], %s304_s18 }
  0x3a   : > { %443 = dma.done.wait (%p552_p7), %s127_s19, 384  }
  0x3b   : > { %445 = vsyncadd (%p552_p7), %s127_s19, 4294966912  ;;  %vm151_vm0 = vcmask 130048   ;;  %v148_v0 = vld [vmem:[%s130_s21] sm:$0xff]  ;;  %v150_v1 = vld [vmem:[%s130_s21 + $0x10] sm:$0xff]  ;;  %vm161_vm1 = vcmask 7168   ;;  %s147_s29 = scalar_lea.vmem [#allocation4], %s304_s18 }
  0x3c   : > { %v149_v2 = vld [vmem:[%s130_s21 + $0x8] sm:$0xff]  ;;  %v152_v3 = vsel %vm151_vm0, %v148_v0, 0.0  ;;  %v158_v4 = vsel %vm151_vm0, %v150_v1, 0.0  ;;  %p660_p7 = scmp.ne.s32.totalorder %s657_s23, 0 }
  0x3d   : > { %153 = vadd.xlane.f32.xlu0 %v152_v3  ;;  %159 = vadd.xlane.f32.xlu1 %v158_v4  ;;  %v155_v5 = vsel %vm151_vm0, %v149_v2, 0.0  ;;  %s305_s20 = smul.u32 (%p660_p7), 6, %s464_s10 }
  0x3f   : > { %s173_s4 = sadd.s32 (%p660_p7), %s460_s9, %s305_s20 }
  0x40   : > { %s299_s6 = sshll.u32 (%p660_p7), %s173_s4, 3 }
  0x41   : > { %156 = vadd.xlane.f32.xlu0 %v155_v5  ;;  %s175_s25 = scalar_lea.vmem (%p660_p7), %s654_s1, %s299_s6 }
  0xc9   : > { %171 = sbr.rel (!%p660_p7) target bundleno = 216 (0xd8), region = 32 }
  0xca   : > { %v154_v6 = vpop.xlane.xlu0 %153  ;;  %v160_v7 = vpop.xlane.xlu1 %159 }
  0xcb   : > { %162 = vst.msk [vmem:[%s147_s29] sm:$0xff] %vm161_vm1, %v154_v6  ;;  %164 = vst.msk [vmem:[%s147_s29 + $0x10] sm:$0xff] %vm161_vm1, %v160_v7 }
  0xce   : > { %v157_v8 = vpop.xlane.xlu0 %156 }
  0xcf   : > { %163 = vst.msk [vmem:[%s147_s29 + $0x8] sm:$0xff] %vm161_vm1, %v157_v8 }
  0xd2   : > { %v207_v9 = vld [vmem:[%s147_s29] sm:$0xff]  ;;  %v211_v11 = vld [vmem:[%s147_s29 + $0x10] sm:$0xff] }
  0xd3   : > { %208 = vst [vmem:[%s175_s25] sm:$0xff] %v207_v9  ;;  %212 = vst [vmem:[%s175_s25 + $0x20] sm:$0xff] %v211_v11 }
  0xd6   : > { %v209_v10 = vld [vmem:[%s147_s29 + $0x8] sm:$0xff] }
  0xd7   : > { %210 = vst [vmem:[%s175_s25 + $0x10] sm:$0xff] %v209_v10 }
  0xd8 PF: > { %s14_s13 = sadd.s32 1, %s476_s13   ;;  %s661_s6 = smov %s452_s7 }
  0xd9   : > { %p11_p9 = scmp.ge.s32.totalorder %s14_s13, 6   ;;  %s662_s7 = smov %s456_s8 }
  0xda   : > { %s663_s8 = smov %s569_s26  ;;  %s664_s9 = smov %s468_s11 }
  0xdb   : > { %s665_s10 = smov %s472_s12  ;;  %s666_s11 = smov %s669_s15 }
  0xdc   : > { %s667_s12 = smov %s673_s16  ;;  %13 = sbr.rel (!%p11_p9) target bundleno = 5 (0x5), region = 102 }
  0xe3   :  { %228 = vsyncpa [#allocation3], 1 }
  0xe4   :  { %230 = vsyncpa [#allocation3 + $0x1], 1 }

</bundles_post_ra>
